<compile_context>
chip_gen: v7x
topology: tpu7x:2x2x1
jax: 0.10.0
libtpu: 0.0.40
codegen_flags: <defaults>
</compile_context>

<pallas_src>
import functools

import numpy as np
import jax
import jax.numpy as jnp
from jax.experimental import pallas as pl
from jax.experimental.pallas import tpu as pltpu


# ---------------------------------------------------------------------------
# __init__ equivalent: build (v0s, v1s, v2s, v3s) index buffers from faces.
# (Host-side preprocessing, done once per mesh — stays outside the kernel.)
# ---------------------------------------------------------------------------
def build_flatten_indices(faces):
    faces = np.asarray(faces, dtype=np.int32)
    edges = np.sort(np.concatenate((faces[:, 0:2], faces[:, 1:3]), axis=0), axis=-1)
    # original uses an unordered set; sort for determinism — loss is order-invariant
    vertices = sorted(set(tuple(int(x) for x in v) for v in edges))
    v0s = np.array([v[0] for v in vertices], "int32")
    v1s = np.array([v[1] for v in vertices], "int32")
    v2s, v3s = [], []
    for v0, v1 in zip(v0s, v1s):
        count = 0
        for face in faces:
            if v0 in face and v1 in face:
                v = np.copy(face)
                v = v[v != v0]
                v = v[v != v1]
                if count == 0:
                    v2s.append(int(v[0]))
                    count += 1
                else:
                    v3s.append(int(v[0]))
    v2s = np.array(v2s, "int32")
    v3s = np.array(v3s, "int32")
    # closed-manifold assumption (same as the original module)
    assert len(v2s) == len(v0s) == len(v3s), "mesh must be a closed manifold"
    return v0s, v1s, v2s, v3s


# ---------------------------------------------------------------------------
# Pallas kernel.
#   input  : p_ref   -> (9, 8, TE8) f32 packed edge-tile block
#                       k = 3*coord + vec; vec in {a=v1-v0, b1=v2-v0, b2=v3-v0}
#   output : out_ref -> (8, TE8)    f32 per-lane partial-sum accumulator
#                       (output-resident across the trailing grid axis)
# ---------------------------------------------------------------------------
def _flatten_loss_kernel(p_ref, out_ref, *, eps, approx):
    e = pl.program_id(1)   # edge-tile reduction axis (last in grid)

    ax, b1x, b2x = p_ref[0], p_ref[1], p_ref[2]
    ay, b1y, b2y = p_ref[3], p_ref[4], p_ref[5]
    az, b1z, b2z = p_ref[6], p_ref[7], p_ref[8]

    # squared lengths with eps folded in once (matches the reference's `l2+eps` uses)
    al2 = ax * ax + ay * ay + az * az + eps
    b1l2 = b1x * b1x + b1y * b1y + b1z * b1z + eps
    b2l2 = b2x * b2x + b2y * b2y + b2z * b2z + eps
    ab1 = ax * b1x + ay * b1y + az * b1z
    ab2 = ax * b2x + ay * b2y + az * b2z

    if approx:
        # 4 EUP pushes per element: 3x rsqrt of products + 1x approx reciprocal.
        inv_al2 = pl.reciprocal(al2, approx=True)
        cos1 = ab1 * jax.lax.rsqrt(al2 * b1l2)
        cos2 = ab2 * jax.lax.rsqrt(al2 * b2l2)
        # max(., 0) guards the approx path (cos^2 can nudge past 1); no-op otherwise
        s1 = jnp.maximum(1.0 - cos1 * cos1, 0.0) + eps
        s2 = jnp.maximum(1.0 - cos2 * cos2, 0.0) + eps
        p1 = ab1 * inv_al2
        p2 = ab2 * inv_al2
        cb1x = b1x - ax * p1
        cb1y = b1y - ay * p1
        cb1z = b1z - az * p1
        cb2x = b2x - ax * p2
        cb2y = b2y - ay * p2
        cb2z = b2z - az * p2
        dd = cb1x * cb2x + cb1y * cb2y + cb1z * cb2z
        cos = dd * jax.lax.rsqrt(b1l2 * s1 * b2l2 * s2)
    else:
        # exact transcription of the PyTorch forward (for strict checking)
        al1 = jnp.sqrt(al2)
        b1l1 = jnp.sqrt(b1l2)
        b2l1 = jnp.sqrt(b2l2)
        inv_al2 = 1.0 / al2
        cos1 = ab1 / (al1 * b1l1 + eps)
        cos2 = ab2 / (al1 * b2l1 + eps)
        sin1 = jnp.sqrt(jnp.maximum(1.0 - cos1 * cos1, 0.0) + eps)
        sin2 = jnp.sqrt(jnp.maximum(1.0 - cos2 * cos2, 0.0) + eps)
        p1 = ab1 * inv_al2
        p2 = ab2 * inv_al2
        cb1x = b1x - ax * p1
        cb1y = b1y - ay * p1
        cb1z = b1z - az * p1
        cb2x = b2x - ax * p2
        cb2y = b2y - ay * p2
        cb2z = b2z - az * p2
        dd = cb1x * cb2x + cb1y * cb2y + cb1z * cb2z
        cos = dd / ((b1l1 * sin1) * (b2l1 * sin2) + eps)

    term = (cos + 1.0) * (cos + 1.0)   # (8, TE8) per-edge-slot loss terms

    @pl.when(e == 0)
    def _first():
        out_ref[...] = term

    @pl.when(e != 0)
    def _rest():
        out_ref[...] += term


# ---------------------------------------------------------------------------
# Forward wrapper (matches FlattenLoss.forward).
# ---------------------------------------------------------------------------
def _round_up(x, m):
    return ((x + m - 1) // m) * m


def _vmem_budget_bytes():
    # Generation-aware scoped-VMEM budget.  Fallback assumes the most
    # constrained generation (v7x: 64 MiB physical) so it is safe everywhere.
    cap = 64 * 1024 * 1024
    try:
        info = pltpu.get_tpu_info()
        cap = int(getattr(info, "vmem_capacity_bytes", cap)) or cap
    except Exception:
        pass
    return max(16 * 1024 * 1024, min(cap // 2, 96 * 1024 * 1024))


def flatten_loss(vertices, v0s, v1s, v2s, v3s, eps=1e-6, average=False,
                 edge_tile=None, approx_recip=True):
    vertices = jnp.asarray(vertices, jnp.float32)
    B, V, _ = vertices.shape
    E = int(np.shape(v0s)[0])

    budget = _vmem_budget_bytes()

    # ---- edge-tile sizing -------------------------------------------------
    # Edges are folded onto (8 sublanes) x (TE/8 lanes), so TE must be a
    # multiple of 8*128 = 1024.  Default targets >= ~1 MiB of packed input per
    # grid step so HBM streaming (not per-step overhead) dominates.
    if edge_tile is None:
        edge_tile = 32 * 1024
    te_cap = max(1024, ((budget // 384) // 1024) * 1024)   # generous headroom
    TE = min(int(edge_tile), te_cap, _round_up(max(E, 1), 1024))
    TE = max(1024, (TE // 1024) * 1024)
    n_tiles = -(-E // TE)                                   # ceil
    Ep = n_tiles * TE
    TE8, Ep8 = TE // 8, Ep // 8

    # ---- single consolidated gather + pre-difference + pack (XLA side) ----
    # One packed (B, 9, 8, Ep/8) stream: k = 3*coord + vec, edges folded onto
    # sublane x lane for full vreg utilization regardless of B.
    vt = jnp.transpose(vertices, (0, 2, 1))                        # (B, 3, V)
    idx = jnp.concatenate([jnp.asarray(i, jnp.int32).reshape(-1)
                           for i in (v0s, v1s, v2s, v3s)])         # (4E,)
    g = jnp.take(vt, idx, axis=2).reshape(B, 3, 4, E)              # (B,3,4,E)
    d = g[:, :, 1:4, :] - g[:, :, 0:1, :]                          # a, b1, b2
    d = d.reshape(B, 9, E)
    d = jnp.pad(d, ((0, 0), (0, 0), (0, Ep - E)))
    packed = d.reshape(B, 9, 8, Ep8)
    # TODO(synk): fuse the gather/difference into the kernel (scalar-prefetched
    # index tiles + VMEM-resident vertex block) to avoid materializing `packed`
    # in HBM — biggest remaining end-to-end win, but TPU in-kernel dynamic
    # gather lowering is fragile, so it stays on the XLA side for now.

    kernel = functools.partial(_flatten_loss_kernel, eps=float(eps),
                               approx=bool(approx_recip))

    out = pl.pallas_call(
        kernel,
        out_shape=jax.ShapeDtypeStruct((B, 8, TE8), jnp.float32),
        grid_spec=pltpu.PrefetchScalarGridSpec(
            num_scalar_prefetch=0,
            grid=(B, n_tiles),                              # reduction axis last
            in_specs=[pl.BlockSpec((None, 9, 8, TE8),
                                   lambda b, e: (b, 0, 0, e))],
            out_specs=pl.BlockSpec((None, 8, TE8),
                                   lambda b, e: (b, 0, 0)),
        ),
        compiler_params=pltpu.CompilerParams(
            dimension_semantics=("parallel", "arbitrary"),  # batch -> megacore
            vmem_limit_bytes=int(budget)),
    )(packed)

    # Zero-padded edge slots contribute exactly (0 + 1)^2 = 1 each (with the
    # default eps the intermediate reciprocals stay finite on zero inputs).
    # Subtract the per-lane pad count BEFORE the cross-lane reduction so tiny
    # meshes with lots of padding suffer no cancellation error.
    pos = np.arange(Ep, dtype=np.int64).reshape(8, Ep8)
    pad_count = (pos >= E).reshape(8, n_tiles, TE8).sum(axis=1).astype(np.float32)
    loss = jnp.sum(out - jnp.asarray(pad_count)[None], axis=(1, 2))   # (B,)

    if average:
        return jnp.sum(loss) / B
    return loss


# ---------------------------------------------------------------------------
# Pure-JAX reference (direct transcription of the PyTorch forward).
# ---------------------------------------------------------------------------
def flatten_loss_ref(vertices, v0s, v1s, v2s, v3s, eps=1e-6, average=False):
    vertices = jnp.asarray(vertices, jnp.float32)
    v0 = vertices[:, v0s, :]
    v1 = vertices[:, v1s, :]
    v2 = vertices[:, v2s, :]
    v3 = vertices[:, v3s, :]
    a1 = v1 - v0
    b1 = v2 - v0
    a1l2 = jnp.sum(a1 ** 2, -1)
    b1l2 = jnp.sum(b1 ** 2, -1)
    a1l1 = jnp.sqrt(a1l2 + eps)
    b1l1 = jnp.sqrt(b1l2 + eps)
    ab1 = jnp.sum(a1 * b1, -1)
    cos1 = ab1 / (a1l1 * b1l1 + eps)
    sin1 = jnp.sqrt(1 - cos1 ** 2 + eps)
    c1 = a1 * (ab1 / (a1l2 + eps))[:, :, None]
    cb1 = b1 - c1
    cb1l1 = b1l1 * sin1
    a2 = v1 - v0
    b2 = v3 - v0
    a2l2 = jnp.sum(a2 ** 2, -1)
    b2l2 = jnp.sum(b2 ** 2, -1)
    a2l1 = jnp.sqrt(a2l2 + eps)
    b2l1 = jnp.sqrt(b2l2 + eps)
    ab2 = jnp.sum(a2 * b2, -1)
    cos2 = ab2 / (a2l1 * b2l1 + eps)
    sin2 = jnp.sqrt(1 - cos2 ** 2 + eps)
    c2 = a2 * (ab2 / (a2l2 + eps))[:, :, None]
    cb2 = b2 - c2
    cb2l1 = b2l1 * sin2
    cos = jnp.sum(cb1 * cb2, -1) / (cb1l1 * cb2l1 + eps)
    loss = jnp.sum((cos + 1) ** 2, axis=1)
    if average:
        return jnp.sum(loss) / vertices.shape[0]
    return loss


if __name__ == "__main__":
    key = jax.random.PRNGKey(0)
    k1, k2, k3 = jax.random.split(key, 3)

    # ----- test 1: tetrahedron (real mesh path, 4 verts / 4 faces / 5 edges)
    tet_faces = np.array([[0, 1, 2], [0, 1, 3], [0, 2, 3], [1, 2, 3]], np.int32)
    v0s, v1s, v2s, v3s = build_flatten_indices(tet_faces)

    B, V = 2, 4
    verts = jax.random.normal(k1, (B, V, 3), dtype=jnp.float32)
    ref = flatten_loss_ref(verts, v0s, v1s, v2s, v3s)

    out_exact = jax.block_until_ready(
        flatten_loss(verts, v0s, v1s, v2s, v3s, approx_recip=False))
    np.testing.assert_allclose(np.asarray(out_exact), np.asarray(ref),
                               rtol=1e-5, atol=1e-5)

    out_fast = jax.block_until_ready(
        flatten_loss(verts, v0s, v1s, v2s, v3s))        # approx EUP path
    np.testing.assert_allclose(np.asarray(out_fast), np.asarray(ref),
                               rtol=5e-2, atol=5e-2)

    avg = jax.block_until_ready(
        flatten_loss(verts, v0s, v1s, v2s, v3s, average=True, approx_recip=False))
    ref_avg = flatten_loss_ref(verts, v0s, v1s, v2s, v3s, average=True)
    np.testing.assert_allclose(np.asarray(avg), np.asarray(ref_avg),
                               rtol=1e-5, atol=1e-5)

    # ----- test 2: synthetic large edge set (multi-tile reduction + padding)
    E2, V2, B2 = 2500, 64, 2
    ki = jax.random.split(k2, 4)
    w0s = np.asarray(jax.random.randint(ki[0], (E2,), 0, V2, dtype=jnp.int32))
    w1s = np.asarray(jax.random.randint(ki[1], (E2,), 0, V2, dtype=jnp.int32))
    w2s = np.asarray(jax.random.randint(ki[2], (E2,), 0, V2, dtype=jnp.int32))
    w3s = np.asarray(jax.random.randint(ki[3], (E2,), 0, V2, dtype=jnp.int32))
    verts2 = jax.random.normal(k3, (B2, V2, 3), dtype=jnp.float32)
    ref2 = flatten_loss_ref(verts2, w0s, w1s, w2s, w3s)

    # forced small tile -> 3 reduction steps per batch + 572 padded edge slots
    out2_exact = jax.block_until_ready(
        flatten_loss(verts2, w0s, w1s, w2s, w3s,
                     edge_tile=1024, approx_recip=False))
    np.testing.assert_allclose(np.asarray(out2_exact), np.asarray(ref2),
                               rtol=1e-4, atol=1e-4)

    # defaults: one large tile per batch, approx EUP rsqrt/reciprocal path
    out2_fast = jax.block_until_ready(
        flatten_loss(verts2, w0s, w1s, w2s, w3s))
    np.testing.assert_allclose(np.asarray(out2_fast), np.asarray(ref2),
                               rtol=5e-2, atol=5e-2)

    print("KERNEL_OK")
</pallas_src>

<mosaic_0001>
module attributes {stable_mosaic.version = 11 : i64} {
  func.func @_flatten_loss_kernel(%arg0: i32, %arg1: i32, %arg2: memref<1x9x8x128xf32, #tpu.memory_space<vmem>>, %arg3: memref<1x8x128xf32, #tpu.memory_space<vmem>>) attributes {dimension_semantics = [#tpu.dimension_semantics<parallel>, #tpu.dimension_semantics<arbitrary>], iteration_bounds = array<i64: 2, 1>, scalar_prefetch = 0 : i64, scratch_operands = 0 : i64, tpu.core_type = #tpu.core_type<tc>, window_params = [{transform_indices = @transform_0, window_bounds = array<i64: 1, 9, 8, 128>}, {transform_indices = @transform_1, window_bounds = array<i64: 1, 8, 128>}]} {
    %c0 = arith.constant 0 : index
    %c0_0 = arith.constant 0 : index
    %c0_1 = arith.constant 0 : index
    %c0_2 = arith.constant 0 : index
    %0 = vector.load %arg2[%c0, %c0_0, %c0_1, %c0_2] : memref<1x9x8x128xf32, #tpu.memory_space<vmem>>, vector<1x1x8x128xf32>
    %1 = vector.shape_cast %0 : vector<1x1x8x128xf32> to vector<8x128xf32>
    %c0_3 = arith.constant 0 : index
    %c1 = arith.constant 1 : index
    %c0_4 = arith.constant 0 : index
    %c0_5 = arith.constant 0 : index
    %2 = vector.load %arg2[%c0_3, %c1, %c0_4, %c0_5] : memref<1x9x8x128xf32, #tpu.memory_space<vmem>>, vector<1x1x8x128xf32>
    %3 = vector.shape_cast %2 : vector<1x1x8x128xf32> to vector<8x128xf32>
    %c0_6 = arith.constant 0 : index
    %c2 = arith.constant 2 : index
    %c0_7 = arith.constant 0 : index
    %c0_8 = arith.constant 0 : index
    %4 = vector.load %arg2[%c0_6, %c2, %c0_7, %c0_8] : memref<1x9x8x128xf32, #tpu.memory_space<vmem>>, vector<1x1x8x128xf32>
    %5 = vector.shape_cast %4 : vector<1x1x8x128xf32> to vector<8x128xf32>
    %c0_9 = arith.constant 0 : index
    %c3 = arith.constant 3 : index
    %c0_10 = arith.constant 0 : index
    %c0_11 = arith.constant 0 : index
    %6 = vector.load %arg2[%c0_9, %c3, %c0_10, %c0_11] : memref<1x9x8x128xf32, #tpu.memory_space<vmem>>, vector<1x1x8x128xf32>
    %7 = vector.shape_cast %6 : vector<1x1x8x128xf32> to vector<8x128xf32>
    %c0_12 = arith.constant 0 : index
    %c4 = arith.constant 4 : index
    %c0_13 = arith.constant 0 : index
    %c0_14 = arith.constant 0 : index
    %8 = vector.load %arg2[%c0_12, %c4, %c0_13, %c0_14] : memref<1x9x8x128xf32, #tpu.memory_space<vmem>>, vector<1x1x8x128xf32>
    %9 = vector.shape_cast %8 : vector<1x1x8x128xf32> to vector<8x128xf32>
    %c0_15 = arith.constant 0 : index
    %c5 = arith.constant 5 : index
    %c0_16 = arith.constant 0 : index
    %c0_17 = arith.constant 0 : index
    %10 = vector.load %arg2[%c0_15, %c5, %c0_16, %c0_17] : memref<1x9x8x128xf32, #tpu.memory_space<vmem>>, vector<1x1x8x128xf32>
    %11 = vector.shape_cast %10 : vector<1x1x8x128xf32> to vector<8x128xf32>
    %c0_18 = arith.constant 0 : index
    %c6 = arith.constant 6 : index
    %c0_19 = arith.constant 0 : index
    %c0_20 = arith.constant 0 : index
    %12 = vector.load %arg2[%c0_18, %c6, %c0_19, %c0_20] : memref<1x9x8x128xf32, #tpu.memory_space<vmem>>, vector<1x1x8x128xf32>
    %13 = vector.shape_cast %12 : vector<1x1x8x128xf32> to vector<8x128xf32>
    %c0_21 = arith.constant 0 : index
    %c7 = arith.constant 7 : index
    %c0_22 = arith.constant 0 : index
    %c0_23 = arith.constant 0 : index
    %14 = vector.load %arg2[%c0_21, %c7, %c0_22, %c0_23] : memref<1x9x8x128xf32, #tpu.memory_space<vmem>>, vector<1x1x8x128xf32>
    %15 = vector.shape_cast %14 : vector<1x1x8x128xf32> to vector<8x128xf32>
    %c0_24 = arith.constant 0 : index
    %c8 = arith.constant 8 : index
    %c0_25 = arith.constant 0 : index
    %c0_26 = arith.constant 0 : index
    %16 = vector.load %arg2[%c0_24, %c8, %c0_25, %c0_26] : memref<1x9x8x128xf32, #tpu.memory_space<vmem>>, vector<1x1x8x128xf32>
    %17 = vector.shape_cast %16 : vector<1x1x8x128xf32> to vector<8x128xf32>
    %18 = arith.mulf %1, %1 : vector<8x128xf32>
    %19 = arith.mulf %7, %7 : vector<8x128xf32>
    %20 = arith.addf %18, %19 : vector<8x128xf32>
    %21 = arith.mulf %13, %13 : vector<8x128xf32>
    %22 = arith.addf %20, %21 : vector<8x128xf32>
    %cst = arith.constant 9.99999997E-7 : f32
    %23 = vector.broadcast %cst : f32 to vector<8x128xf32>
    %24 = arith.addf %22, %23 : vector<8x128xf32>
    %25 = arith.mulf %3, %3 : vector<8x128xf32>
    %26 = arith.mulf %9, %9 : vector<8x128xf32>
    %27 = arith.addf %25, %26 : vector<8x128xf32>
    %28 = arith.mulf %15, %15 : vector<8x128xf32>
    %29 = arith.addf %27, %28 : vector<8x128xf32>
    %cst_27 = arith.constant 9.99999997E-7 : f32
    %30 = vector.broadcast %cst_27 : f32 to vector<8x128xf32>
    %31 = arith.addf %29, %30 : vector<8x128xf32>
    %32 = arith.mulf %5, %5 : vector<8x128xf32>
    %33 = arith.mulf %11, %11 : vector<8x128xf32>
    %34 = arith.addf %32, %33 : vector<8x128xf32>
    %35 = arith.mulf %17, %17 : vector<8x128xf32>
    %36 = arith.addf %34, %35 : vector<8x128xf32>
    %cst_28 = arith.constant 9.99999997E-7 : f32
    %37 = vector.broadcast %cst_28 : f32 to vector<8x128xf32>
    %38 = arith.addf %36, %37 : vector<8x128xf32>
    %39 = arith.mulf %1, %3 : vector<8x128xf32>
    %40 = arith.mulf %7, %9 : vector<8x128xf32>
    %41 = arith.addf %39, %40 : vector<8x128xf32>
    %42 = arith.mulf %13, %15 : vector<8x128xf32>
    %43 = arith.addf %41, %42 : vector<8x128xf32>
    %44 = arith.mulf %1, %5 : vector<8x128xf32>
    %45 = arith.mulf %7, %11 : vector<8x128xf32>
    %46 = arith.addf %44, %45 : vector<8x128xf32>
    %47 = arith.mulf %13, %17 : vector<8x128xf32>
    %48 = arith.addf %46, %47 : vector<8x128xf32>
    %49 = math.sqrt %24 : vector<8x128xf32>
    %50 = math.sqrt %31 : vector<8x128xf32>
    %51 = math.sqrt %38 : vector<8x128xf32>
    %cst_29 = arith.constant 1.000000e+00 : f32
    %52 = vector.broadcast %cst_29 : f32 to vector<8x128xf32>
    %53 = arith.divf %52, %24 : vector<8x128xf32>
    %54 = arith.mulf %49, %50 : vector<8x128xf32>
    %cst_30 = arith.constant 9.99999997E-7 : f32
    %55 = vector.broadcast %cst_30 : f32 to vector<8x128xf32>
    %56 = arith.addf %54, %55 : vector<8x128xf32>
    %57 = arith.divf %43, %56 : vector<8x128xf32>
    %58 = arith.mulf %49, %51 : vector<8x128xf32>
    %cst_31 = arith.constant 9.99999997E-7 : f32
    %59 = vector.broadcast %cst_31 : f32 to vector<8x128xf32>
    %60 = arith.addf %58, %59 : vector<8x128xf32>
    %61 = arith.divf %48, %60 : vector<8x128xf32>
    %62 = arith.mulf %57, %57 : vector<8x128xf32>
    %cst_32 = arith.constant 1.000000e+00 : f32
    %63 = vector.broadcast %cst_32 : f32 to vector<8x128xf32>
    %64 = arith.subf %63, %62 : vector<8x128xf32>
    %cst_33 = arith.constant 0.000000e+00 : f32
    %65 = vector.broadcast %cst_33 : f32 to vector<8x128xf32>
    %66 = arith.maximumf %64, %65 : vector<8x128xf32>
    %cst_34 = arith.constant 9.99999997E-7 : f32
    %67 = vector.broadcast %cst_34 : f32 to vector<8x128xf32>
    %68 = arith.addf %66, %67 : vector<8x128xf32>
    %69 = math.sqrt %68 : vector<8x128xf32>
    %70 = arith.mulf %61, %61 : vector<8x128xf32>
    %cst_35 = arith.constant 1.000000e+00 : f32
    %71 = vector.broadcast %cst_35 : f32 to vector<8x128xf32>
    %72 = arith.subf %71, %70 : vector<8x128xf32>
    %cst_36 = arith.constant 0.000000e+00 : f32
    %73 = vector.broadcast %cst_36 : f32 to vector<8x128xf32>
    %74 = arith.maximumf %72, %73 : vector<8x128xf32>
    %cst_37 = arith.constant 9.99999997E-7 : f32
    %75 = vector.broadcast %cst_37 : f32 to vector<8x128xf32>
    %76 = arith.addf %74, %75 : vector<8x128xf32>
    %77 = math.sqrt %76 : vector<8x128xf32>
    %78 = arith.mulf %43, %53 : vector<8x128xf32>
    %79 = arith.mulf %48, %53 : vector<8x128xf32>
    %80 = arith.mulf %1, %78 : vector<8x128xf32>
    %81 = arith.subf %3, %80 : vector<8x128xf32>
    %82 = arith.mulf %7, %78 : vector<8x128xf32>
    %83 = arith.subf %9, %82 : vector<8x128xf32>
    %84 = arith.mulf %13, %78 : vector<8x128xf32>
    %85 = arith.subf %15, %84 : vector<8x128xf32>
    %86 = arith.mulf %1, %79 : vector<8x128xf32>
    %87 = arith.subf %5, %86 : vector<8x128xf32>
    %88 = arith.mulf %7, %79 : vector<8x128xf32>
    %89 = arith.subf %11, %88 : vector<8x128xf32>
    %90 = arith.mulf %13, %79 : vector<8x128xf32>
    %91 = arith.subf %17, %90 : vector<8x128xf32>
    %92 = arith.mulf %81, %87 : vector<8x128xf32>
    %93 = arith.mulf %83, %89 : vector<8x128xf32>
    %94 = arith.addf %92, %93 : vector<8x128xf32>
    %95 = arith.mulf %85, %91 : vector<8x128xf32>
    %96 = arith.addf %94, %95 : vector<8x128xf32>
    %97 = arith.mulf %50, %69 : vector<8x128xf32>
    %98 = arith.mulf %51, %77 : vector<8x128xf32>
    %99 = arith.mulf %97, %98 : vector<8x128xf32>
    %cst_38 = arith.constant 9.99999997E-7 : f32
    %100 = vector.broadcast %cst_38 : f32 to vector<8x128xf32>
    %101 = arith.addf %99, %100 : vector<8x128xf32>
    %102 = arith.divf %96, %101 : vector<8x128xf32>
    %cst_39 = arith.constant 1.000000e+00 : f32
    %103 = vector.broadcast %cst_39 : f32 to vector<8x128xf32>
    %104 = arith.addf %102, %103 : vector<8x128xf32>
    %cst_40 = arith.constant 1.000000e+00 : f32
    %105 = vector.broadcast %cst_40 : f32 to vector<8x128xf32>
    %106 = arith.addf %102, %105 : vector<8x128xf32>
    %107 = arith.mulf %104, %106 : vector<8x128xf32>
    %c0_i32 = arith.constant 0 : i32
    %108 = arith.cmpi eq, %arg1, %c0_i32 : i32
    %109 = arith.extui %108 : i1 to i32
    %c0_i32_41 = arith.constant 0 : i32
    %110 = arith.cmpi ne, %109, %c0_i32_41 : i32
    scf.if %110 {
      %c0_44 = arith.constant 0 : index
      %c0_45 = arith.constant 0 : index
      %c0_46 = arith.constant 0 : index
      %114 = vector.load %arg3[%c0_44, %c0_45, %c0_46] : memref<1x8x128xf32, #tpu.memory_space<vmem>>, vector<1x8x128xf32>
      %115 = vector.shape_cast %114 : vector<1x8x128xf32> to vector<8x128xf32>
      %116 = vector.shape_cast %107 : vector<8x128xf32> to vector<1x8x128xf32>
      tpu.vector_store %arg3[%c0_44, %c0_45, %c0_46], %116 {strides = array<i32>} : memref<1x8x128xf32, #tpu.memory_space<vmem>>, vector<1x8x128xf32>,
    } else {
    }
    %c0_i32_42 = arith.constant 0 : i32
    %111 = arith.cmpi ne, %arg1, %c0_i32_42 : i32
    %112 = arith.extui %111 : i1 to i32
    %c0_i32_43 = arith.constant 0 : i32
    %113 = arith.cmpi ne, %112, %c0_i32_43 : i32
    scf.if %113 {
      %c0_44 = arith.constant 0 : index
      %c0_45 = arith.constant 0 : index
      %c0_46 = arith.constant 0 : index
      %114 = vector.load %arg3[%c0_44, %c0_45, %c0_46] : memref<1x8x128xf32, #tpu.memory_space<vmem>>, vector<1x8x128xf32>
      %115 = vector.shape_cast %114 : vector<1x8x128xf32> to vector<8x128xf32>
      %116 = arith.addf %115, %107 : vector<8x128xf32>
      %c0_47 = arith.constant 0 : index
      %c0_48 = arith.constant 0 : index
      %c0_49 = arith.constant 0 : index
      %117 = vector.load %arg3[%c0_47, %c0_48, %c0_49] : memref<1x8x128xf32, #tpu.memory_space<vmem>>, vector<1x8x128xf32>
      %118 = vector.shape_cast %117 : vector<1x8x128xf32> to vector<8x128xf32>
      %119 = vector.shape_cast %116 : vector<8x128xf32> to vector<1x8x128xf32>
      tpu.vector_store %arg3[%c0_47, %c0_48, %c0_49], %119 {strides = array<i32>} : memref<1x8x128xf32, #tpu.memory_space<vmem>>, vector<1x8x128xf32>,
    } else {
    }
    return
  }
  func.func @transform_0(%arg0: i32, %arg1: i32) -> (i32, i32, i32, i32) {
    %c0_i32 = arith.constant 0 : i32
    %c0_i32_0 = arith.constant 0 : i32
    %c0_i32_1 = arith.constant 0 : i32
    return %arg0, %c0_i32, %c0_i32_0, %arg1 : i32, i32, i32, i32
  }
  func.func @transform_1(%arg0: i32, %arg1: i32) -> (i32, i32, i32) {
    %c0_i32 = arith.constant 0 : i32
    %c0_i32_0 = arith.constant 0 : i32
    %c0_i32_1 = arith.constant 0 : i32
    return %arg0, %c0_i32, %c0_i32_0 : i32, i32, i32
  }
}

</mosaic_0001>

<bundles_post_ra>
// kernel: tpu_custom_call.1
= control target key start
LH: loop header
LB: loop body
LE: loop exit
PB: predicated region body
PF: predicated region fallthrough
CT: control target
= control target key end

     0   :  { %6 = vsyncpa [#allocation3], 0  ;;  %s847_s0 = inlined_call_operand.hbm [shape: f32[2,9,8,128], index: 0, kind: input, shape index: {}]   ;;  %s848_s1 = inlined_call_operand.hbm [shape: f32[2,8,128], index: 1, kind: output, shape index: {}]  }
   0x1   :  { %8 = vsyncpa [#allocation3 + $0x1], 0 }
   0x2   :  { %9 = vsyncpa [#allocation4], 0 }
   0x3   :  { %11 = vsyncpa [#allocation4 + $0x1], 0  ;;  %s613_s6 = smov 0   ;;  %s615_s7 = smov 0  }
   0x4   :  { %s617_s8 = smov 0   ;;  %s619_s9 = smov 0  }
   0x5   :  { %s621_s10 = smov 0   ;;  %s623_s11 = smov 0  }
   0x6 LB: > { %s381_s12 = sadd.s32 4294967295, %s597_s11   ;;  %s382_s13 = sadd.s32 4294967294, %s597_s11   ;;  %s597_s11 = sphi %s623_s11, %s17_s11   ;;  %s593_s10 = sphi %s621_s10, %s863_s10   ;;  %s589_s9 = sphi %s619_s9, %s862_s9   ;;  %s585_s8 = sphi %s617_s8, %s861_s8   ;;  %s581_s7 = sphi %s615_s7, %s860_s7   ;;  %s577_s6 = sphi %s613_s6, %s859_s6  }
   0x7   : > { %s29_s14 = sadd.s32 1, %s593_s10  ;;  %s38_s15 = sadd.s32 1, %s585_s8 }
   0x8   : > { %p31_p0 = scmp.ge.s32.totalorder %s29_s14, 2  ;;  %p45_p1 = scmp.ne.s32.totalorder %s585_s8, %s581_s7 }
   0x9   : > { %p46_p2 = scmp.eq.s32.totalorder %s597_s11, 0  ;;  %p51_p3 = scmp.ne.s32.totalorder %s581_s7, %s577_s6 }
   0xa   : > { %s865_s14 = smov (%p31_p0, %s29_s14), 0  ;;  %p52_p5 = scmp.eq.s32.totalorder %s381_s12, 0 }
   0xb   : > { %p654_p4 = por %p46_p2, %p45_p1  ;;  %s33_s17 = ssub.s32 %s593_s10, %s865_s14 }
   0xc   : > { %p75_p6 = scmp.eq.s32.totalorder %s381_s12, 1  ;;  %p36_p7 = scmp.eq.s32.totalorder %s33_s17, 0 }
   0xd   : > { %p660_p8 = por %p52_p5, %p51_p3  ;;  %p81_p10 = scmp.eq.s32.totalorder %s382_s13, 1 }
   0xe   : > { %p664_p9 = por %p75_p6, %p45_p1  ;;  %p415_p13 = scmp.lt.s32.totalorder %s597_s11, 2 }
   0xf   : > { %s669_s20 = scalar_select %p36_p7, %s585_s8, %s38_s15  }
  0x10   : > { %s852_s19 = scalar_select %p664_p9, 1, 0 }
  0x11   : > { %p671_p11 = por %p81_p10, %p51_p3  ;;  %s101_s22 = sand.u32 1, %s585_s8  }
  0x12   : > { %s400_s23 = smul.u32 72, %s101_s22  ;;  %p681_p0 = pnand %p415_p13, %p654_p4 }
  0x13   : > { %s853_s21 = scalar_select %p671_p11, 1, 0 }
  0x14   : > { %s401_s24 = smul.u32 1152, %s593_s10  ;;  %s105_s29 = scalar_lea.vmem [#allocation2], %s400_s23 }
  0x15   : > { %s113_s30 = sshll.u32 %s105_s29, 4  ;;  %s693_s2 = scalar_lea.sflag [#allocation3], %s101_s22  ;;  %s690_s30 = int_to_ptr.vmem [resolvable:$true] %s113_s30 }
  0x16   : > { %s688_s28 = scalar_lea.hbm %s847_s0, %s401_s24  ;;  %p487_p3 = pneg %p681_p0 }
  0x17   : > { %s485_s3 = scalar_lea.hbm %s688_s28, 1152  ;;  %s490_s12 = scalar_lea.hbm %s847_s0, 2304 }
  0x18   : > { %p486_p2 = scmp.ne.s32.totalorder %s688_s28, %s485_s3  ;;  %p491_p6 = scmp.lt.u32.totalorder %s688_s28, %s847_s0 }
  0x19   : > { %p492_p7 = scmp.lt.u32.totalorder %s490_s12, %s485_s3  ;;  %p494_p13 = scmp.lt.u32.totalorder %s485_s3, %s688_s28 }
  0x1a   : > { %p488_p4 = pnand %p487_p3, %p486_p2 }
  0x1b   : > { %p493_p10 = por %p492_p7, %p491_p6 }
  0x1c   : > { %p489_p5 = pneg %p488_p4 }
  0x1d   : > { %p495_p12 = por %p494_p13, %p493_p10 }
  0x1f   : > { %p496_p1 = pnand %p495_p12, %p489_p5 }
  0x21   : > { %499 = shalt.err (!%p496_p1)
}
  0x22   : > { %s500_s16 = scalar_lea.vmem %s690_s30, 1152  ;;  %s599_s17 = smov [#allocation2]  }
  0x23   : > { %p501_p2 = scmp.ne.s32.totalorder %s690_s30, %s500_s16  ;;  %s505_s22 = sshll.u32 %s599_s17, 4  ;;  %s506_s22 = int_to_ptr.vmem [resolvable:$false] %s505_s22 }
  0x24   : > { %s507_s23 = scalar_lea.vmem %s506_s22, 2304  ;;  %p508_p9 = scmp.lt.s32.totalorder %s690_s30, %s506_s22 }
  0x25   : > { %p503_p4 = pnand %p501_p2, %p487_p3  ;;  %p509_p6 = scmp.lt.s32.totalorder %s507_s23, %s500_s16 }
  0x27   : > { %p504_p11 = pneg %p503_p4  ;;  %p510_p7 = por %p509_p6, %p508_p9 }
  0x29   : > { %p511_p10 = pnand %p510_p7, %p504_p11 }
  0x2b   : > { %514 = shalt.err (!%p511_p10)
}
  0x2c   : > { %s600_s24 = smov 128   ;;  %s601_s26 = smov 8  }
  0x2d   : > { %410 = dma.hbm_to_vmem [thread:$0]  (!%p681_p0), %s688_s28, 1152, %s690_s30, %s693_s2, %s600_s24, %s600_s24, %s601_s26  }
  0x2e   : > { %p121_p12 = scmp.lt.s32.totalorder %s597_s11, 3  ;;  %p855_p1 = scmp.ge.s32.totalorder %s597_s11, 1 }
  0x30   : > { %p122_p3 = pnand %p855_p1, %p121_p12 }
  0x31   : > { %s725_s27 = sand.u32 (!%p122_p3), 1, %s581_s7  }
  0x32   : > { %125 = sbr.rel (%p122_p3) target bundleno = 162 (0xa2), region = 24  ;;  %s128_s3 = scalar_lea.sflag (!%p122_p3), [#allocation3], %s725_s27 }
  0x33   : > { %s402_s29 = smul.u32 (!%p122_p3), 72, %s725_s27 }
  0x35   : > { %s131_s4 = scalar_lea.vmem (!%p122_p3), [#allocation2], %s402_s29 }
  0x39   : > { %568 = dma.done.wait (%p660_p8), %s128_s3, 1152  }
  0x3a   : > { %570 = vsyncadd (%p660_p8), %s128_s3, 4294966144  ;;  %v733_v0 = vld [vmem:[%s131_s4] sm:$0xff]  ;;  %v735_v1 = vld [vmem:[%s131_s4 + $0x8] sm:$0xff]  ;;  %s387_s18 = sshll.u32 %s725_s27, 3  ;;  %s397_s30 = sshll.u32 %s589_s9, 7 }
  0x3b   : > { %v737_v2 = vld [vmem:[%s131_s4 + $0x10] sm:$0xff]  ;;  %v739_v3 = vld [vmem:[%s131_s4 + $0x18] sm:$0xff]  ;;  %v741_v4 = vld [vmem:[%s131_s4 + $0x20] sm:$0xff]  ;;  %v167_v6 = vmul.f32 %v733_v0, %v733_v0  ;;  %v173_v7 = vmul.f32 %v735_v1, %v735_v1  ;;  %v185_v27 = vmul.f32 %v735_v1, %v733_v0  ;;  %s149_s25 = scalar_lea.vmem [#allocation5], %s387_s18  ;;  %s800_s12 = scalar_lea.hbm %s848_s1, %s397_s30 }
  0x3c   : > { %v743_v5 = vld [vmem:[%s131_s4 + $0x28] sm:$0xff]  ;;  %v179_v8 = vmul.f32 %v737_v2, %v737_v2  ;;  %v751_v9 = vld [vmem:[%s131_s4 + $0x30] sm:$0xff]  ;;  %v753_v10 = vld [vmem:[%s131_s4 + $0x38] sm:$0xff]  ;;  %v168_v12 = vmul.f32 %v739_v3, %v739_v3  ;;  %v174_v13 = vmul.f32 %v741_v4, %v741_v4  ;;  %v186_v28 = vmul.f32 %v741_v4, %v739_v3  ;;  %s301_s28 = sshll.u32 %s149_s25, 4  ;;  %s288_s13 = scalar_lea.sflag [#allocation4], %s725_s27  ;;  %s795_s28 = int_to_ptr.vmem [resolvable:$true] %s301_s28 }
  0x3d   : > { %v755_v11 = vld [vmem:[%s131_s4 + $0x40] sm:$0xff]  ;;  %v180_v14 = vmul.f32 %v743_v5, %v743_v5  ;;  %v170_v15 = vmul.f32 %v751_v9, %v751_v9  ;;  %v176_v16 = vmul.f32 %v753_v10, %v753_v10  ;;  %v190_v29 = vmul.f32 %v737_v2, %v733_v0  ;;  %s515_s15 = scalar_lea.vmem %s795_s28, 128  ;;  %p856_p9 = scmp.ne.s32.totalorder %s852_s19, 0 }
  0x3e   : > { %v182_v17 = vmul.f32 %v755_v11, %v755_v11  ;;  %v169_v18 = vadd.f32 %v168_v12, %v167_v6  ;;  %v175_v19 = vadd.f32 %v174_v13, %v173_v7  ;;  %v191_v30 = vmul.f32 %v743_v5, %v739_v3  ;;  %p516_p8 = scmp.ne.s32.totalorder %s795_s28, %s515_s15  ;;  %s602_s9 = smov [#allocation5]  }
  0x3f   : > { %v181_v20 = vadd.f32 %v180_v14, %v179_v8  ;;  %v187_v31 = vadd.f32 %v186_v28, %v185_v27  ;;  %v188_v32 = vmul.f32 %v753_v10, %v751_v9  ;;  %v193_v34 = vmul.f32 %v755_v11, %v751_v9  ;;  %s519_s16 = sshll.u32 %s602_s9, 4  ;;  %s520_s16 = int_to_ptr.vmem [resolvable:$false] %s519_s16 }
  0x40   : > { %v171_v21 = vadd.f32 %v170_v15, %v169_v18  ;;  %v177_v22 = vadd.f32 %v176_v16, %v175_v19  ;;  %v192_v33 = vadd.f32 %v191_v30, %v190_v29  ;;  %p517_p11 = pnand %p516_p8, %p856_p9  ;;  %s521_s17 = scalar_lea.vmem %s520_s16, 256 }
  0x41   : > { %v183_v23 = vadd.f32 %v182_v17, %v181_v20  ;;  %v189_v36 = vadd.f32 %v188_v32, %v187_v31  ;;  %p522_p5 = scmp.lt.s32.totalorder %s795_s28, %s520_s16  ;;  %p523_p13 = scmp.lt.s32.totalorder %s521_s17, %s515_s15 }
  0x42   : > { %v172_v24 = vadd.f32 1e-06, %v171_v21  ;;  %v178_v25 = vadd.f32 1e-06, %v177_v22  ;;  %v194_v37 = vadd.f32 %v193_v34, %v192_v33  ;;  %p518_p0 = pneg %p517_p11 }
  0x43   : > { %v184_v26 = vadd.f32 1e-06, %v183_v23  ;;  %p524_p2 = por %p523_p13, %p522_p5 }
  0x44   : > { %467 = vrsqrt.f32 %v172_v24  ;;  %vm197_vm0 = vcmp.eq.f32.partialorder %v172_v24, inf  ;;  %v200_v38 = vand.u32 2147483648, %v172_v24  ;;  %vm199_vm1 = vcmp.eq.f32.partialorder %v172_v24, 0.0 }
  0x45   : > { %469 = vrsqrt.f32 %v178_v25  ;;  %vm204_vm2 = vcmp.eq.f32.partialorder %v178_v25, inf  ;;  %v207_v41 = vand.u32 2147483648, %v178_v25  ;;  %vm206_vm3 = vcmp.eq.f32.partialorder %v178_v25, 0.0  ;;  %p525_p4 = pnand %p524_p2, %p518_p0 }
  0x46   : > { %471 = vrsqrt.f32 %v184_v26  ;;  %vm211_vm4 = vcmp.eq.f32.partialorder %v184_v26, inf  ;;  %v214_v44 = vand.u32 2147483648, %v184_v26  ;;  %vm213_vm5 = vcmp.eq.f32.partialorder %v184_v26, 0.0 }
  0x47   : > { %473 = vrcp.f32 %v172_v24 }
  0x4e   : > { %v468_v35 = vpop.eup %467 }
  0x4f   : > { %v470_v39 = vpop.eup %469  ;;  %v196_v40 = vmul.f32 %v468_v35, %v172_v24 }
  0x50   : > { %v472_v42 = vpop.eup %471  ;;  %v203_v43 = vmul.f32 %v470_v39, %v178_v25 }
  0x51   : > { %v474_v45 = vpop.eup %473  ;;  %v198_v46 = vsel %vm197_vm0, %v172_v24, %v196_v40  ;;  %v210_v47 = vmul.f32 %v472_v42, %v184_v26 }
  0x52   : > { %v201_v48 = vsel %vm199_vm1, %v200_v38, %v198_v46  ;;  %v205_v49 = vsel %vm204_vm2, %v178_v25, %v203_v43  ;;  %v248_v50 = vmul.f32 %v474_v45, %v189_v36  ;;  %v249_v51 = vmul.f32 %v474_v45, %v194_v37 }
  0x53   : > { %v208_v52 = vsel %vm206_vm3, %v207_v41, %v205_v49  ;;  %v212_v53 = vsel %vm211_vm4, %v184_v26, %v210_v47 }
  0x54   : > { %v215_v54 = vsel %vm213_vm5, %v214_v44, %v212_v53  ;;  %v218_v55 = vmul.f32 %v208_v52, %v201_v48  ;;  %v250_v56 = vmul.f32 %v248_v50, %v733_v0  ;;  %v252_v57 = vmul.f32 %v739_v3, %v248_v50 }
  0x55   : > { %v222_v58 = vmul.f32 %v215_v54, %v201_v48  ;;  %v254_v59 = vmul.f32 %v751_v9, %v248_v50  ;;  %v256_v60 = vmul.f32 %v249_v51, %v733_v0  ;;  %v258_v61 = vmul.f32 %v739_v3, %v249_v51 }
  0x56   : > { %v219_v62 = vadd.f32 1e-06, %v218_v55  ;;  %v251_v63 = vsub.f32 %v735_v1, %v250_v56  ;;  %v253_v6 = vsub.f32 %v741_v4, %v252_v57  ;;  %v260_v7 = vmul.f32 %v751_v9, %v249_v51 }
  0x57   : > { %v223_v8 = vadd.f32 1e-06, %v222_v58  ;;  %v255_v12 = vsub.f32 %v753_v10, %v254_v59  ;;  %v257_v13 = vsub.f32 %v737_v2, %v256_v60  ;;  %v259_v14 = vsub.f32 %v743_v5, %v258_v61 }
  0x58   : > { %475 = vrcp.f32 %v219_v62  ;;  %v261_v15 = vsub.f32 %v755_v11, %v260_v7 }
  0x59   : > { %477 = vrcp.f32 %v223_v8  ;;  %v262_v0 = vmul.f32 %v257_v13, %v251_v63  ;;  %v263_v3 = vmul.f32 %v259_v14, %v253_v6 }
  0x5a   : > { %v265_v16 = vmul.f32 %v261_v15, %v255_v12 }
  0x5b   : > { %v264_v17 = vadd.f32 %v263_v3, %v262_v0 }
  0x5d   : > { %v266_v1 = vadd.f32 %v265_v16, %v264_v17 }
  0x62   : > { %v476_v18 = vpop.eup %475 }
  0x63   : > { %v478_v4 = vpop.eup %477  ;;  %v221_v19 = vmul.f32 %v476_v18, %v189_v36 }
  0x64   : > { %v225_v9 = vmul.f32 %v478_v4, %v194_v37 }
  0x65   : > { %v226_v20 = vmul.f32 %v221_v19, %v221_v19 }
  0x66   : > { %v237_v21 = vmul.f32 %v225_v9, %v225_v9 }
  0x67   : > { %v227_v10 = vsub.f32 1.0, %v226_v20 }
  0x68   : > { %v238_v22 = vsub.f32 1.0, %v237_v21 }
  0x69   : > { %v228_v2 = vmax.f32 %v227_v10, 0.0 }
  0x6a   : > { %v239_v23 = vmax.f32 %v238_v22, 0.0 }
  0x6b   : > { %v229_v5 = vadd.f32 1e-06, %v228_v2 }
  0x6c   : > { %v240_v24 = vadd.f32 1e-06, %v239_v23 }
  0x6d   : > { %479 = vrsqrt.f32 %v229_v5  ;;  %vm232_vm6 = vcmp.eq.f32.partialorder %v229_v5, inf  ;;  %v235_v25 = vand.u32 2147483648, %v229_v5  ;;  %vm234_vm7 = vcmp.eq.f32.partialorder %v229_v5, 0.0 }
  0x6e   : > { %481 = vrsqrt.f32 %v240_v24  ;;  %vm243_vm8 = vcmp.eq.f32.partialorder %v240_v24, inf  ;;  %v246_v28 = vand.u32 2147483648, %v240_v24  ;;  %vm245_vm9 = vcmp.eq.f32.partialorder %v240_v24, 0.0 }
  0x77   : > { %v480_v11 = vpop.eup %479 }
  0x78   : > { %v482_v26 = vpop.eup %481  ;;  %v231_v27 = vmul.f32 %v480_v11, %v229_v5 }
  0x79   : > { %v242_v29 = vmul.f32 %v482_v26, %v240_v24 }
  0x7a   : > { %v233_v30 = vsel %vm232_vm6, %v229_v5, %v231_v27 }
  0x7b   : > { %v236_v31 = vsel %vm234_vm7, %v235_v25, %v233_v30  ;;  %v244_v32 = vsel %vm243_vm8, %v240_v24, %v242_v29 }
  0x7c   : > { %v247_v33 = vsel %vm245_vm9, %v246_v28, %v244_v32  ;;  %v267_v34 = vmul.f32 %v236_v31, %v208_v52 }
  0x7d   : > { %v268_v35 = vmul.f32 %v247_v33, %v215_v54 }
  0x7f   : > { %v269_v36 = vmul.f32 %v268_v35, %v267_v34 }
  0x81   : > { %v270_v37 = vadd.f32 1e-06, %v269_v36 }
  0x83   : > { %483 = vrcp.f32 %v270_v37 }
  0x8d   : > { %v484_v38 = vpop.eup %483 }
  0x8e   : > { %v272_v39 = vmul.f32 %v484_v38, %v266_v1 }
  0x90   : > { %v273_v40 = vadd.f32 1.0, %v272_v39 }
  0x92   : > { %v274_v41 = vmul.f32 %v273_v40, %v273_v40 }
  0x94   : > { %279 = vst [vmem:[%s149_s25] sm:$0xff] %v274_v41 }
  0x95   : > { %528 = shalt.err (!%p525_p4)
}
  0x96   : > { %s529_s22 = scalar_lea.hbm %s800_s12, 128  ;;  %s533_s26 = scalar_lea.hbm %s848_s1, 256 }
  0x97   : > { %p530_p6 = scmp.ne.s32.totalorder %s800_s12, %s529_s22  ;;  %p534_p12 = scmp.lt.u32.totalorder %s800_s12, %s848_s1 }
  0x98   : > { %p535_p1 = scmp.lt.u32.totalorder %s533_s26, %s529_s22  ;;  %p537_p8 = scmp.lt.u32.totalorder %s529_s22, %s800_s12 }
  0x99   : > { %p531_p7 = pnand %p530_p6, %p856_p9 }
  0x9a   : > { %p536_p3 = por %p535_p1, %p534_p12 }
  0x9b   : > { %p532_p10 = pneg %p531_p7 }
  0x9c   : > { %p538_p11 = por %p537_p8, %p536_p3 }
  0x9e   : > { %p539_p0 = pnand %p538_p11, %p532_p10 }
  0xa0   : > { %542 = shalt.err (!%p539_p0)
}
  0xa1   : > { %405 = dma.vmem_to_hbm [thread:$0]  (%p856_p9), %s795_s28, 128, %s800_s12, %s288_s13  }
  0xa2 PF: > { %s313_s3 = sand.u32 1, %s577_s6   ;;  %p857_p5 = scmp.ne.s32.totalorder %s853_s21, 0 }
  0xa3   : > { %p858_p13 = scmp.ge.s32.totalorder %s597_s11, 2  ;;  %s314_s4 = scalar_lea.sflag [#allocation4], %s313_s3 }
  0xa5   : > { %p412_p2 = pnand %p858_p13, %p857_p5 }
  0xa7   : > { %572 = dma.done.wait (!%p412_p2), %s314_s4, 128  }
  0xa8   : > { %574 = vsyncadd (!%p412_p2), %s314_s4, 4294967168  ;;  %s17_s11 = sadd.s32 1, %s597_s11   ;;  %s859_s6 = smov %s581_s7 }
  0xa9   : > { %p14_p4 = scmp.ge.s32.totalorder %s17_s11, 4   ;;  %s860_s7 = smov %s585_s8 }
  0xaa   : > { %s861_s8 = smov %s669_s20  ;;  %s862_s9 = smov %s593_s10 }
  0xab   : > { %s863_s10 = smov %s865_s14  ;;  %16 = sbr.rel (!%p14_p4) target bundleno = 6 (0x6), region = 85 }
  0xb2   :  { %319 = vsyncpa [#allocation3], 1 }
  0xb3   :  { %321 = vsyncpa [#allocation3 + $0x1], 1 }
  0xb4   :  { %322 = vsyncpa [#allocation4], 1 }
  0xb5   :  { %324 = vsyncpa [#allocation4 + $0x1], 1 }

</bundles_post_ra>
